<compile_context>
chip_gen: v7x
topology: tpu7x:2x2x1
jax: 0.10.0
libtpu: 0.0.40
codegen_flags: <defaults>
</compile_context>

<pallas_src>
import functools
import math

import jax
import jax.numpy as jnp
from jax.experimental import pallas as pl
from jax.experimental.pallas import tpu as pltpu

_VMEM_LIMIT = 32 * 1024 * 1024  # raise scoped-VMEM; well under v7x's 64 MiB


def _round_up(x, m):
    return ((x + m - 1) // m) * m


# ----------------------------- kernels -------------------------------------


def _msg_kernel(h_ref, w_ref, norm_ref, o_ref):
    # msg = (h @ W) * norm_src ; bf16 MXU operands, f32 accumulate + epilogue.
    hw = jnp.dot(h_ref[...], w_ref[...], preferred_element_type=jnp.float32)
    o_ref[...] = (hw * norm_ref[...]).astype(o_ref.dtype)


def _agg_kernel(mask_ref, adj_ref, msg_ref, norm_dst_ref, bias_ref, o_ref,
                acc_ref, *, apply_relu):
    # out = act( norm_dst * sum_k A[i,k] @ msg[k] + bias ), accumulated over k.
    i = pl.program_id(0)
    k = pl.program_id(1)

    @pl.when(k == 0)
    def _():
        acc_ref[...] = jnp.zeros_like(acc_ref)

    @pl.when(mask_ref[i, k] != 0)          # skip all-zero adjacency tiles
    def _():
        acc_ref[...] += jnp.dot(adj_ref[...], msg_ref[...],
                                preferred_element_type=jnp.float32)

    @pl.when(k == pl.num_programs(1) - 1)
    def _():
        out = acc_ref[...] * norm_dst_ref[...] + bias_ref[...]
        if apply_relu:
            out = jnp.maximum(out, 0.0)
        o_ref[...] = out.astype(o_ref.dtype)


def _reparam_kernel(mean_ref, logstd_ref, noise_ref, z_ref):
    z_ref[...] = (noise_ref[...] * jnp.exp(logstd_ref[...])
                  + mean_ref[...]).astype(z_ref.dtype)


def _decode_kernel(zi_ref, zj_ref, a_ref):
    # A_pred tile = sigmoid(Z_i @ Z_j^T)
    s = jax.lax.dot_general(zi_ref[...], zj_ref[...],
                            (((1,), (1,)), ((), ())),
                            preferred_element_type=jnp.float32)
    a_ref[...] = (1.0 / (1.0 + jnp.exp(-s))).astype(a_ref.dtype)


# ----------------------------- wrappers -------------------------------------


def gcn_layer(h, weight, bias, adj_bf16, tile_mask, norm, *, apply_relu,
              tm, tk, out_dtype):
    """One GCN layer on padded inputs.

    h:        (N_pad, Fin_pad)   any float dtype (cast to bf16 for the MXU)
    weight:   (Fin_pad, Fout_pad)
    bias:     (1, Fout_pad) f32
    adj_bf16: (N_pad, N_pad) bf16, adj[i, j] = 1 iff edge j -> i
    tile_mask:(N_pad//tm, N_pad//tk) int32 per-tile nonzero flags
    norm:     (N_pad, 1) f32 (D^{-1/2}); padded rows are 0
    """
    n_pad, fin = h.shape
    fout = weight.shape[1]
    n_i, n_k = n_pad // tm, n_pad // tk

    # Stage 1 (hoisted out of the adjacency loop): msg = (h @ W) * norm_src.
    msg = pl.pallas_call(
        _msg_kernel,
        out_shape=jax.ShapeDtypeStruct((n_pad, fout), jnp.bfloat16),
        grid=(n_k,),
        in_specs=[
            pl.BlockSpec((tk, fin), lambda i: (i, 0)),
            pl.BlockSpec((fin, fout), lambda i: (0, 0)),
            pl.BlockSpec((tk, 1), lambda i: (i, 0)),
        ],
        out_specs=pl.BlockSpec((tk, fout), lambda i: (i, 0)),
        compiler_params=pltpu.CompilerParams(
            dimension_semantics=("parallel",),
            vmem_limit_bytes=_VMEM_LIMIT),
    )(h.astype(jnp.bfloat16), weight.astype(jnp.bfloat16), norm)

    # Stage 2: out = act(norm_dst * (A @ msg) + bias), tiled over (dst, src).
    cost = pl.CostEstimate(
        flops=2 * n_pad * n_pad * fout + 3 * n_pad * fout,
        transcendentals=0,
        bytes_accessed=(2 * n_pad * n_pad + 2 * n_pad * fout + 4 * n_pad
                        + 4 * fout + n_pad * fout
                        * jnp.dtype(out_dtype).itemsize))
    return pl.pallas_call(
        functools.partial(_agg_kernel, apply_relu=apply_relu),
        out_shape=jax.ShapeDtypeStruct((n_pad, fout), out_dtype),
        grid_spec=pltpu.PrefetchScalarGridSpec(
            num_scalar_prefetch=1,
            grid=(n_i, n_k),
            in_specs=[
                pl.BlockSpec((tm, tk), lambda i, k, m: (i, k)),    # adj tile
                pl.BlockSpec((tk, fout), lambda i, k, m: (k, 0)),  # msg (src)
                pl.BlockSpec((tm, 1), lambda i, k, m: (i, 0)),     # norm_dst
                pl.BlockSpec((1, fout), lambda i, k, m: (0, 0)),   # bias
            ],
            out_specs=pl.BlockSpec((tm, fout), lambda i, k, m: (i, 0)),
            scratch_shapes=[pltpu.VMEM((tm, fout), jnp.float32)],
        ),
        compiler_params=pltpu.CompilerParams(
            dimension_semantics=("parallel", "arbitrary"),
            vmem_limit_bytes=_VMEM_LIMIT),
        cost_estimate=cost,
    )(tile_mask, adj_bf16, msg, norm, bias)


def vgae_forward(X, adj, norm, params, noise, *, hidden_dims, tm=128, tk=128):
    """Full VGAE forward (isGlobal=False, dropout=0). Returns (A_pred, Z)."""
    w1, b1, wm, bm, ws, bs = params
    n, in_dim = X.shape
    h1 = w1.shape[1]                       # 128 (fixed by VGAE)
    hd = hidden_dims

    n_pad = _round_up(n, max(tm, tk))
    fin_pad = _round_up(in_dim, 128)
    h1_pad = _round_up(h1, 128)
    hd_pad = _round_up(hd, 128)

    def pad2(x, r, c):
        return jnp.pad(x, ((0, r - x.shape[0]), (0, c - x.shape[1])))

    x_pad = pad2(X, n_pad, fin_pad)
    adj_pad = pad2(adj, n_pad, n_pad)
    norm_pad = pad2(norm.reshape(n, 1), n_pad, 1)
    noise_pad = pad2(noise, n_pad, hd_pad)

    w1_pad = pad2(w1, fin_pad, h1_pad)
    b1_pad = pad2(b1.reshape(1, h1), 1, h1_pad)
    # mean / logstd heads share a single adjacency pass: concat out features.
    wml = jnp.concatenate(
        [pad2(wm, h1_pad, hd_pad), pad2(ws, h1_pad, hd_pad)], axis=1)
    bml = jnp.concatenate(
        [pad2(bm.reshape(1, hd), 1, hd_pad), pad2(bs.reshape(1, hd), 1, hd_pad)],
        axis=1)

    # per-(dst,src)-tile nonzero flags for adjacency-tile skipping
    n_i, n_k = n_pad // tm, n_pad // tk
    tile_mask = (adj_pad.reshape(n_i, tm, n_k, tk).sum(axis=(1, 3)) > 0
                 ).astype(jnp.int32)
    adj_bf16 = adj_pad.astype(jnp.bfloat16)   # 0/1 entries: exact in bf16

    # layer 1: in_dim -> 128, ReLU (bf16 writeback; it only feeds bf16 matmuls)
    hidden = gcn_layer(x_pad, w1_pad, b1_pad, adj_bf16, tile_mask, norm_pad,
                       apply_relu=True, tm=tm, tk=tk, out_dtype=jnp.bfloat16)
    # layer 2: 128 -> [mean || logstd], no activation, f32 output
    ml = gcn_layer(hidden, wml, bml, adj_bf16, tile_mask, norm_pad,
                   apply_relu=False, tm=tm, tk=tk, out_dtype=jnp.float32)

    # reparameterization: Z = noise * exp(logstd) + mean (mean/logstd are the
    # two column blocks of ml; indexed directly via BlockSpecs, no host slice)
    z_pad = pl.pallas_call(
        _reparam_kernel,
        out_shape=jax.ShapeDtypeStruct((n_pad, hd_pad), jnp.float32),
        grid=(n_pad // tm,),
        in_specs=[
            pl.BlockSpec((tm, hd_pad), lambda i: (i, 0)),   # mean block
            pl.BlockSpec((tm, hd_pad), lambda i: (i, 1)),   # logstd block
            pl.BlockSpec((tm, hd_pad), lambda i: (i, 0)),   # noise
        ],
        out_specs=pl.BlockSpec((tm, hd_pad), lambda i: (i, 0)),
        compiler_params=pltpu.CompilerParams(
            dimension_semantics=("parallel",),
            vmem_limit_bytes=_VMEM_LIMIT),
    )(ml, ml, noise_pad)

    # decoder: A_pred = sigmoid(Z @ Z.T), tiled over (row, col) output blocks
    cost = pl.CostEstimate(flops=2 * n_pad * n_pad * hd_pad,
                           transcendentals=n_pad * n_pad,
                           bytes_accessed=8 * n_pad * hd_pad + 4 * n_pad * n_pad)
    a_pad = pl.pallas_call(
        _decode_kernel,
        out_shape=jax.ShapeDtypeStruct((n_pad, n_pad), jnp.float32),
        grid=(n_pad // tm, n_pad // tm),
        in_specs=[
            pl.BlockSpec((tm, hd_pad), lambda i, j: (i, 0)),
            pl.BlockSpec((tm, hd_pad), lambda i, j: (j, 0)),
        ],
        out_specs=pl.BlockSpec((tm, tm), lambda i, j: (i, j)),
        compiler_params=pltpu.CompilerParams(
            dimension_semantics=("parallel", "parallel"),
            vmem_limit_bytes=_VMEM_LIMIT),
        cost_estimate=cost,
    )(z_pad, z_pad)

    return a_pad[:n, :n], z_pad[:n, :hd]


# ----------------------------- demo / check ---------------------------------

if __name__ == "__main__":
    key = jax.random.PRNGKey(0)
    n, in_dim, hidden1, hidden_dims = 200, 16, 128, 32
    (k_x, k_adj, k_noise, k_w1, k_b1, k_wm, k_bm, k_ws, k_bs
     ) = jax.random.split(key, 9)

    def uniform(k, shape, fan_out):
        # GCNLayer / NodeApplyModule reset_parameters: U(-1/sqrt(out), 1/sqrt(out))
        stdv = 1.0 / math.sqrt(fan_out)
        return jax.random.uniform(k, shape, jnp.float32, -stdv, stdv)

    w1 = uniform(k_w1, (in_dim, hidden1), hidden1)
    b1 = uniform(k_b1, (hidden1,), hidden1)
    wm = uniform(k_wm, (hidden1, hidden_dims), hidden_dims)
    bm = uniform(k_bm, (hidden_dims,), hidden_dims)
    ws = uniform(k_ws, (hidden1, hidden_dims), hidden_dims)
    bs = uniform(k_bs, (hidden_dims,), hidden_dims)

    X = jax.random.normal(k_x, (n, in_dim), jnp.float32)
    # random sparse graph + self-loops; adj[i, j] = 1 iff edge j -> i
    adj = (jax.random.uniform(k_adj, (n, n)) < 0.05).astype(jnp.float32)
    adj = jnp.maximum(adj, jnp.eye(n, dtype=jnp.float32))
    deg = adj.sum(axis=1, keepdims=True)        # in-degree (>= 1 via self-loops)
    norm = 1.0 / jnp.sqrt(deg)                  # node 'norm' data, D^{-1/2}
    # gaussian noise of the reparameterization (torch.randn equivalent)
    noise = jax.random.normal(k_noise, (n, hidden_dims), jnp.float32)

    params = (w1, b1, wm, bm, ws, bs)
    a_pred, z = vgae_forward(X, adj, norm, params, noise,
                             hidden_dims=hidden_dims, tm=128, tk=128)
    (a_pred, z) = jax.block_until_ready((a_pred, z))

    # plain-JAX reference mirroring the kernels' bf16-operand / f32-accumulate
    # policy (adjacency is 0/1 so its bf16 cast is exact)
    def reference():
        bf16, f32 = jnp.bfloat16, jnp.float32

        def gcn(h, w, b, relu):
            hw = jnp.dot(h.astype(bf16), w.astype(bf16),
                         preferred_element_type=f32)
            msg = (hw * norm).astype(bf16)
            acc = jnp.dot(adj.astype(bf16), msg, preferred_element_type=f32)
            out = acc * norm + b[None, :]
            return jnp.maximum(out, 0.0) if relu else out

        hidden = gcn(X, w1, b1, True).astype(bf16)
        mean = gcn(hidden, wm, bm, False)
        logstd = gcn(hidden, ws, bs, False)
        z_ref = noise * jnp.exp(logstd) + mean
        a_ref = 1.0 / (1.0 + jnp.exp(
            -jnp.dot(z_ref, z_ref.T, preferred_element_type=f32)))
        return a_ref, z_ref

    a_ref, z_ref = reference()
    assert a_pred.shape == (n, n) and z.shape == (n, hidden_dims)
    assert jnp.allclose(z, z_ref, atol=2e-2, rtol=2e-2), \
        float(jnp.max(jnp.abs(z - z_ref)))
    assert jnp.allclose(a_pred, a_ref, atol=2e-2, rtol=2e-2), \
        float(jnp.max(jnp.abs(a_pred - a_ref)))
    print("KERNEL_OK")
</pallas_src>

<mosaic_0001>
module attributes {stable_mosaic.version = 11 : i64} {
  func.func @_msg_kernel(%arg0: i32, %arg1: memref<128x128xbf16, #tpu.memory_space<vmem>>, %arg2: memref<128x128xbf16, #tpu.memory_space<vmem>>, %arg3: memref<128x1xf32, #tpu.memory_space<vmem>>, %arg4: memref<128x128xbf16, #tpu.memory_space<vmem>>) attributes {dimension_semantics = [#tpu.dimension_semantics<parallel>], iteration_bounds = array<i64: 2>, scalar_prefetch = 0 : i64, scratch_operands = 0 : i64, tpu.core_type = #tpu.core_type<tc>, window_params = [{transform_indices = @transform_0, window_bounds = array<i64: 128, 128>}, {pipeline_mode = #tpu.pipeline_mode<synchronous>, transform_indices = @transform_1, window_bounds = array<i64: 128, 128>}, {transform_indices = @transform_2, window_bounds = array<i64: 128, 1>}, {transform_indices = @transform_3, window_bounds = array<i64: 128, 128>}]} {
    %c0 = arith.constant 0 : index
    %c0_0 = arith.constant 0 : index
    %0 = vector.load %arg1[%c0, %c0_0] : memref<128x128xbf16, #tpu.memory_space<vmem>>, vector<128x128xbf16>
    %c0_1 = arith.constant 0 : index
    %c0_2 = arith.constant 0 : index
    %1 = vector.load %arg2[%c0_1, %c0_2] : memref<128x128xbf16, #tpu.memory_space<vmem>>, vector<128x128xbf16>
    %cst = arith.constant dense<0.000000e+00> : vector<128x128xf32>
    %2 = tpu.matmul %0, %1, %cst {dimension_numbers = #tpu.dot_dimension_numbers<[1], [0], [0], [1], [0, 0, 1, 1], [], []>} : vector<128x128xbf16>, vector<128x128xbf16>, vector<128x128xf32> -> vector<128x128xf32>
    %c0_3 = arith.constant 0 : index
    %c0_4 = arith.constant 0 : index
    %3 = vector.load %arg3[%c0_3, %c0_4] : memref<128x1xf32, #tpu.memory_space<vmem>>, vector<128x1xf32>
    %4 = vector.broadcast %3 : vector<128x1xf32> to vector<128x128xf32>
    %5 = arith.mulf %2, %4 : vector<128x128xf32>
    %6 = arith.truncf %5 : vector<128x128xf32> to vector<128x128xbf16>
    %c0_5 = arith.constant 0 : index
    %c0_6 = arith.constant 0 : index
    %7 = vector.load %arg4[%c0_5, %c0_6] : memref<128x128xbf16, #tpu.memory_space<vmem>>, vector<128x128xbf16>
    tpu.vector_store %arg4[%c0_5, %c0_6], %6 {strides = array<i32>} : memref<128x128xbf16, #tpu.memory_space<vmem>>, vector<128x128xbf16>,
    return
  }
  func.func @transform_0(%arg0: i32) -> (i32, i32) {
    %c0_i32 = arith.constant 0 : i32
    %c0_i32_0 = arith.constant 0 : i32
    return %arg0, %c0_i32 : i32, i32
  }
  func.func @transform_1(%arg0: i32) -> (i32, i32) {
    %c0_i32 = arith.constant 0 : i32
    %c0_i32_0 = arith.constant 0 : i32
    %c0_i32_1 = arith.constant 0 : i32
    return %c0_i32, %c0_i32_0 : i32, i32
  }
  func.func @transform_2(%arg0: i32) -> (i32, i32) {
    %c0_i32 = arith.constant 0 : i32
    %c0_i32_0 = arith.constant 0 : i32
    return %arg0, %c0_i32 : i32, i32
  }
  func.func @transform_3(%arg0: i32) -> (i32, i32) {
    %c0_i32 = arith.constant 0 : i32
    %c0_i32_0 = arith.constant 0 : i32
    return %arg0, %c0_i32 : i32, i32
  }
}

</mosaic_0001>

<bundles_post_ra>
// kernel: tpu_custom_call.1
= control target key start
LH: loop header
LB: loop body
LE: loop exit
PB: predicated region body
PF: predicated region fallthrough
CT: control target
= control target key end

     0   :  { %8 = vsyncpa [#allocation3], 0  ;;  %s1194_s0 = inlined_call_operand.vmem [shape: bf16[256,128], index: 0, kind: input, shape index: {}]   ;;  %s1195_s1 = inlined_call_operand.vmem [shape: bf16[128,128], index: 1, kind: input, shape index: {}]   ;;  %s1196_s2 = inlined_call_operand.vmem [shape: f32[256,1], index: 2, kind: input, shape index: {}]   ;;  %s1197_s3 = inlined_call_operand.hbm [shape: bf16[256,128], index: 3, kind: output, shape index: {}]  }
   0x1   :  { %10 = vsyncpa [#allocation3 + $0x1], 0  ;;  %s1022_s12 = smov 0   ;;  %s1024_s13 = smov 0  }
   0x2   :  { %s1026_s14 = smov 0   ;;  %s1028_s15 = smov 0  }
   0x3 LB: > { %s1043_s16 = sadd.s32 4294967295, %s996_s15   ;;  %s700_s17 = sadd.s32 4294967294, %s996_s15   ;;  %s996_s15 = sphi %s1028_s15, %s1203_s15   ;;  %s992_s14 = sphi %s1026_s14, %s1202_s14   ;;  %s988_s13 = sphi %s1024_s13, %s1201_s13   ;;  %s984_s12 = sphi %s1022_s12, %s1200_s12  }
   0x4   : > { %s1047_s18 = sadd.s32 1, %s996_s15   ;;  %s96_s19 = sadd.s32 1, %s992_s14 }
   0x5   : > { %s93_s20 = ssub.s32 %s996_s15, %s1047_s18  ;;  %p106_p0 = scmp.ne.s32.totalorder %s992_s14, %s988_s13 }
   0x6   : > { %p94_p1 = scmp.eq.s32.totalorder %s93_s20, 0  ;;  %p107_p2 = scmp.eq.s32.totalorder %s1043_s16, 1 }
   0x7   : > { %p112_p3 = scmp.ne.s32.totalorder %s988_s13, %s984_s12  ;;  %p113_p4 = scmp.eq.s32.totalorder %s700_s17, 1 }
   0x8   : > { %s1058_s21 = scalar_select %p94_p1, %s992_s14, %s96_s19  }
   0x9   : > { %p1060_p5 = por %p107_p2, %p106_p0  ;;  %p1064_p6 = por %p113_p4, %p112_p3 }
   0xa   : > { %p703_p7 = scmp.ge.s32.totalorder %s996_s15, 1  ;;  %p152_p8 = scmp.lt.s32.totalorder %s996_s15, 3 }
   0xc   : > { %p153_p9 = pnand %p703_p7, %p152_p8 }
   0xd   : > { %v918_v0 = vld [vmem:[%s1195_s1] sm:$0xff] (!%p153_p9)   ;;  %s705_s26 = sshll.u32 (!%p153_p9), %s1043_s16, 4  ;;  %v919_v1 = vld [vmem:[%s1195_s1 + $0x8] sm:$0xff] (!%p153_p9)   ;;  %v920_v2 = vld [vmem:[%s1195_s1 + $0x10] sm:$0xff] (!%p153_p9)   ;;  %v998_v3 = vmov (!%p153_p9), 0   ;;  %s999_s19 = smov (!%p153_p9), [#allocation2]  }
   0xe   : > { %156 = sbr.rel (%p153_p9) target bundleno = 288 (0x120), region = 32  ;;  %p182_p10 = scmp.lt.s32.totalorder (!%p153_p9), %s705_s26, 31  ;;  %826 = vmatprep.subr.bf16.mxu0 (!%p153_p9), %v918_v0  ;;  %858 = vmatprep.subr.bf16.mxu1 (!%p153_p9), %v918_v0  ;;  %v921_v4 = vld [vmem:[%s1195_s1 + $0x18] sm:$0xff] (!%p153_p9)   ;;  %v922_v7 = vld [vmem:[%s1195_s1 + $0x20] sm:$0xff] (!%p153_p9)   ;;  %v923_v8 = vld [vmem:[%s1195_s1 + $0x28] sm:$0xff] (!%p153_p9)  }
   0xf   : > { %827 = vmatpush3.bf16.msra.mxu0 (!%p153_p9), %v918_v0  ;;  %866 = vmatpush3.bf16.msra.mxu1 (!%p153_p9), %v918_v0  ;;  %v924_v13 = vld [vmem:[%s1195_s1 + $0x30] sm:$0xff] (!%p153_p9)   ;;  %v925_v16 = vld [vmem:[%s1195_s1 + $0x38] sm:$0xff] (!%p153_p9)   ;;  %s938_s20 = sshll.u32 (!%p153_p9), %s999_s19, 4  ;;  %s939_s20 = int_to_ptr.vmem [resolvable:$false] %s938_s20 }
  0x10   : > { %828 = vmatprep.subr.bf16.mxu0 (!%p153_p9), %v919_v1  ;;  %859 = vmatprep.subr.bf16.mxu1 (!%p153_p9), %v919_v1 }
  0x11   : > { %917 = vset.pattern.permute.xlu1 (!%p153_p9), %v998_v3  ;;  %916 = vset.pattern.permute.xlu0 (!%p153_p9), %v998_v3 }
  0x13   : > { %829 = vmatpush3.bf16.msra.mxu0 (!%p153_p9), %v919_v1  ;;  %867 = vmatpush3.bf16.msra.mxu1 (!%p153_p9), %v919_v1 }
  0x14   : > { %830 = vmatprep.subr.bf16.mxu0 (!%p153_p9), %v920_v2  ;;  %860 = vmatprep.subr.bf16.mxu1 (!%p153_p9), %v920_v2 }
  0x15   : > { %s1205_s26 = smov (!%p182_p10, %s705_s26), 31 }
  0x16   : > { %s706_s4 = sshll.u32 %s1205_s26, 2  ;;  %s708_s10 = sshll.u32 %s1205_s26, 3 }
  0x17   : > { %s1083_s7 = scalar_lea.vmem %s1194_s0, %s706_s4  ;;  %831 = vmatpush3.bf16.msra.mxu0 %v920_v2  ;;  %868 = vmatpush3.bf16.msra.mxu1 %v920_v2  ;;  %s1096_s24 = scalar_lea.vmem %s1196_s2, %s708_s10 }
  0x18   : > { %v926_v5 = vld [vmem:[%s1083_s7] sm:$0xff]   ;;  %832 = vmatprep.subr.bf16.mxu0 %v921_v4  ;;  %861 = vmatprep.subr.bf16.mxu1 %v921_v4  ;;  %v422_v9 = vld [vmem:[%s1096_s24 + $0x10] sm:$0xff]  ;;  %v423_v11 = vld [vmem:[%s1096_s24 + $0x18] sm:$0xff]  ;;  %s178_s4 = sand.u32 1, %s988_s13  }
  0x19   : > { %v927_v6 = vld [vmem:[%s1083_s7 + $0x20] sm:$0xff]   ;;  %842 = vmatprep.mubr.bf16.mxu0 %v926_v5  ;;  %448 = vperm.xlu1 %917, %v422_v9   ;;  %v421_v12 = vld [vmem:[%s1096_s24 + $0x8] sm:$0xff]  ;;  %v427_v17 = vld [vmem:[%s1096_s24 + $0x38] sm:$0xff]  ;;  %s704_s5 = sshll.u32 %s178_s4, 6  ;;  %s1153_s11 = scalar_lea.sflag [#allocation3], %s178_s4 }
  0x1a   : > { %850 = vmatprep.mubr.bf16.mxu1 %v927_v6  ;;  %v420_v10 = vld [vmem:[%s1096_s24] sm:$0xff]  ;;  %v425_v14 = vld [vmem:[%s1096_s24 + $0x28] sm:$0xff]  ;;  %v426_v18 = vld [vmem:[%s1096_s24 + $0x30] sm:$0xff]  ;;  %s1132_s6 = scalar_lea.vmem [#allocation2], %s704_s5 }
  0x1b   : > { %833 = vmatpush3.bf16.msra.mxu0 %v921_v4  ;;  %869 = vmatpush3.bf16.msra.mxu1 %v921_v4  ;;  %v424_v15 = vld [vmem:[%s1096_s24 + $0x20] sm:$0xff]  ;;  %v928_v19 = vld [vmem:[%s1083_s7 + $0x8] sm:$0xff]   ;;  %v930_v23 = vld [vmem:[%s1083_s7 + $0x10] sm:$0xff]   ;;  %s626_s8 = sshll.u32 %s1132_s6, 4  ;;  %s1145_s8 = int_to_ptr.vmem [resolvable:$true] %s626_s8 }
  0x1c   : > { %834 = vmatprep.subr.bf16.mxu0 %v922_v7  ;;  %862 = vmatprep.subr.bf16.mxu1 %v922_v7  ;;  %v929_v20 = vld [vmem:[%s1083_s7 + $0x28] sm:$0xff]   ;;  %v428_v22 = vld [vmem:[%s1096_s24 + $0x40] sm:$0xff]  ;;  %v931_v24 = vld [vmem:[%s1083_s7 + $0x30] sm:$0xff]   ;;  %s934_s17 = scalar_lea.vmem %s1145_s8, 1024  ;;  %p941_p0 = scmp.lt.s32.totalorder %s1145_s8, %s939_s20 }
  0x1d   : > { %438 = vperm.xlu0 %916, %v420_v10   ;;  %453 = vperm.xlu1 %917, %v423_v11   ;;  %v429_v21 = vld [vmem:[%s1096_s24 + $0x48] sm:$0xff]  ;;  %v431_v25 = vld [vmem:[%s1096_s24 + $0x58] sm:$0xff]  ;;  %v430_v26 = vld [vmem:[%s1096_s24 + $0x50] sm:$0xff]  ;;  %p935_p11 = scmp.ne.s32.totalorder %s1145_s8, %s934_s17 }
  0x1e   : > { %v932_v27 = vld [vmem:[%s1083_s7 + $0x18] sm:$0xff]   ;;  %v433_v29 = vld [vmem:[%s1096_s24 + $0x68] sm:$0xff]  ;;  %v432_v30 = vld [vmem:[%s1096_s24 + $0x60] sm:$0xff] }
  0x1f   : > { %835 = vmatpush3.bf16.msra.mxu0 %v922_v7  ;;  %870 = vmatpush3.bf16.msra.mxu1 %v922_v7  ;;  %v933_v28 = vld [vmem:[%s1083_s7 + $0x38] sm:$0xff]   ;;  %v434_v32 = vld [vmem:[%s1096_s24 + $0x70] sm:$0xff]  ;;  %s762_s7 = sshll.u32 %s1043_s16, 10  ;;  %p936_p12 = pnand %p935_p11, %p1060_p5 }
  0x20   : > { %836 = vmatprep.subr.bf16.mxu0 %v923_v8  ;;  %863 = vmatprep.subr.bf16.mxu1 %v923_v8  ;;  %v435_v31 = vld [vmem:[%s1096_s24 + $0x78] sm:$0xff]  ;;  %s1143_s10 = scalar_lea.hbm %s1197_s3, %s762_s7  ;;  %s940_s24 = scalar_lea.vmem %s939_s20, 2048 }
  0x21   : > { %443 = vperm.xlu0 %916, %v421_v12   ;;  %463 = vperm.xlu1 %917, %v425_v14   ;;  %p937_p13 = pneg %p936_p12  ;;  %p942_p1 = scmp.lt.s32.totalorder %s940_s24, %s934_s17 }
  0x23   : > { %837 = vmatpush3.bf16.msra.mxu0 %v923_v8  ;;  %871 = vmatpush3.bf16.msra.mxu1 %v923_v8  ;;  %p943_p2 = por %p942_p1, %p941_p0 }
  0x24   : > { %838 = vmatprep.subr.bf16.mxu0 %v924_v13  ;;  %864 = vmatprep.subr.bf16.mxu1 %v924_v13 }
  0x25   : > { %458 = vperm.xlu0 %916, %v424_v15   ;;  %473 = vperm.xlu1 %917, %v427_v17   ;;  %p944_p3 = pnand %p943_p2, %p937_p13 }
  0x27   : > { %839 = vmatpush3.bf16.msra.mxu0 %v924_v13  ;;  %872 = vmatpush3.bf16.msra.mxu1 %v924_v13 }
  0x28   : > { %840 = vmatprep.subr.bf16.mxu0 %v925_v16  ;;  %865 = vmatprep.subr.bf16.mxu1 %v925_v16 }
  0x29   : > { %468 = vperm.xlu0 %916, %v426_v18   ;;  %483 = vperm.xlu1 %917, %v429_v21  }
  0x2b   : > { %841 = vmatpush3.bf16.msra.mxu0 %v925_v16  ;;  %873 = vmatpush3.bf16.msra.mxu1 %v925_v16 }
  0x2d   : > { %478 = vperm.xlu0 %916, %v428_v22   ;;  %493 = vperm.xlu1 %917, %v431_v25  }
  0x2e   : > { %843 = vmatmul.mubr.bf16.vlgmr.msra.gmra.mrb[0].mxu0 %v928_v19  ;;  %851 = vmatmul.mubr.bf16.vlgmr.msra.gmra.mrb[0].mxu1 %v929_v20 }
  0x2f   : > { %846 = vmatprep.mubr.bf16.mxu0 %v930_v23  ;;  %854 = vmatprep.mubr.bf16.mxu1 %v931_v24 }
  0x31   : > { %488 = vperm.xlu0 %916, %v430_v26   ;;  %503 = vperm.xlu1 %917, %v433_v29  }
  0x35   : > { %498 = vperm.xlu0 %916, %v432_v30   ;;  %513 = vperm.xlu1 %917, %v435_v31  }
  0x36   : > { %847 = vmatmul.mubr.bf16.gmra.mrb[4].mxu0 %v932_v27  ;;  %855 = vmatmul.mubr.bf16.gmra.mrb[4].mxu1 %v933_v28 }
  0x39   : > { %508 = vperm.xlu0 %916, %v434_v32  }
  0x98   : > { %v449_v33 = vpop.permute.xlu1 %448 }
  0x9c   : > { %v439_v34 = vpop.permute.xlu0 %438  ;;  %v454_v35 = vpop.permute.xlu1 %453 }
  0xa0   : > { %v444_v36 = vpop.permute.xlu0 %443  ;;  %v464_v37 = vpop.permute.xlu1 %463 }
  0xa4   : > { %v459_v38 = vpop.permute.xlu0 %458  ;;  %v474_v39 = vpop.permute.xlu1 %473 }
  0xa8   : > { %v469_v40 = vpop.permute.xlu0 %468  ;;  %v484_v41 = vpop.permute.xlu1 %483 }
  0xac   : > { %v479_v42 = vpop.permute.xlu0 %478  ;;  %v494_v43 = vpop.permute.xlu1 %493 }
  0xb0   : > { %v489_v44 = vpop.permute.xlu0 %488  ;;  %v504_v45 = vpop.permute.xlu1 %503 }
  0xb4   : > { %v499_v46 = vpop.permute.xlu0 %498  ;;  %v514_v3 = vpop.permute.xlu1 %513 }
  0xb8   : > { %v509_v4 = vpop.permute.xlu0 %508 }
 0x101   : > { %v844_v47 = vpop.f32.mrb[0].mxu0  ;;  %v852_v48 = vpop.f32.mrb[0].mxu1 }
 0x102   : > { %v357_v49 = vpop.f32.mrb[1].mxu0  ;;  %v389_v50 = vpop.f32.mrb[1].mxu1  ;;  %v518_v53 = vmul.f32 %v844_v47, %v449_v33  ;;  %v526_v54 = vmul.f32 %v852_v48, %v489_v44 }
 0x103   : > { %v845_v51 = vpop.f32.mrb[2].mxu0  ;;  %v853_v52 = vpop.f32.mrb[2].mxu1  ;;  %v516_v59 = vmul.f32 %v439_v34, %v357_v49  ;;  %v524_v60 = vmul.f32 %v479_v42, %v389_v50 }
 0x104   : > { %v519_v55 = vmul.f32 %v845_v51, %v454_v35  ;;  %v527_v56 = vmul.f32 %v853_v52, %v494_v43  ;;  %v360_v57 = vpop.f32.mrb[3].mxu0  ;;  %v392_v58 = vpop.f32.mrb[3].mxu1 }
 0x105   : > { %v517_v61 = vmul.f32 %v444_v36, %v360_v57  ;;  %v525_v62 = vmul.f32 %v484_v41, %v392_v58 }
 0x106   : > { %v771_v63 = vpack.c.bf16 %v519_v55, %v518_v53  ;;  %v791_v0 = vpack.c.bf16 %v527_v56, %v526_v54 }
 0x107   : > { %v766_v1 = vpack.c.bf16 %v517_v61, %v516_v59  ;;  %v786_v2 = vpack.c.bf16 %v525_v62, %v524_v60 }
 0x108   : > { %803 = vst [vmem:[%s1132_s6 + $0x8] sm:$0xff] %v771_v63   ;;  %807 = vst [vmem:[%s1132_s6 + $0x28] sm:$0xff] %v791_v0  }
 0x109   : > { %767 = vst [vmem:[%s1132_s6] sm:$0xff] %v766_v1   ;;  %806 = vst [vmem:[%s1132_s6 + $0x20] sm:$0xff] %v786_v2   ;;  %v848_v5 = vpop.f32.mrb[4].mxu0  ;;  %v856_v6 = vpop.f32.mrb[4].mxu1 }
 0x10a   : > { %v373_v7 = vpop.f32.mrb[5].mxu0  ;;  %v405_v8 = vpop.f32.mrb[5].mxu1  ;;  %v522_v11 = vmul.f32 %v848_v5, %v469_v40  ;;  %v530_v12 = vmul.f32 %v856_v6, %v509_v4 }
 0x10b   : > { %v849_v9 = vpop.f32.mrb[6].mxu0  ;;  %v857_v10 = vpop.f32.mrb[6].mxu1  ;;  %v520_v17 = vmul.f32 %v459_v38, %v373_v7  ;;  %v528_v18 = vmul.f32 %v499_v46, %v405_v8 }
 0x10c   : > { %v523_v13 = vmul.f32 %v849_v9, %v474_v39  ;;  %v531_v14 = vmul.f32 %v857_v10, %v514_v3  ;;  %v376_v15 = vpop.f32.mrb[7].mxu0  ;;  %v408_v16 = vpop.f32.mrb[7].mxu1 }
 0x10d   : > { %v521_v19 = vmul.f32 %v464_v37, %v376_v15  ;;  %v529_v20 = vmul.f32 %v504_v45, %v408_v16 }
 0x10e   : > { %v781_v21 = vpack.c.bf16 %v523_v13, %v522_v11  ;;  %v801_v22 = vpack.c.bf16 %v531_v14, %v530_v12 }
 0x10f   : > { %v776_v23 = vpack.c.bf16 %v521_v19, %v520_v17  ;;  %v796_v24 = vpack.c.bf16 %v529_v20, %v528_v18 }
 0x110   : > { %805 = vst [vmem:[%s1132_s6 + $0x18] sm:$0xff] %v781_v21   ;;  %809 = vst [vmem:[%s1132_s6 + $0x38] sm:$0xff] %v801_v22  }
 0x111   : > { %804 = vst [vmem:[%s1132_s6 + $0x10] sm:$0xff] %v776_v23   ;;  %808 = vst [vmem:[%s1132_s6 + $0x30] sm:$0xff] %v796_v24  }
 0x112   : > { %947 = shalt.err (!%p944_p3)
}
 0x113   : > { %s948_s25 = scalar_lea.hbm %s1143_s10, 1024  ;;  %s952_s28 = scalar_lea.hbm %s1197_s3, 2048 }
 0x114   : > { %p949_p4 = scmp.ne.s32.totalorder %s1143_s10, %s948_s25  ;;  %p953_p9 = scmp.lt.u32.totalorder %s1143_s10, %s1197_s3 }
 0x115   : > { %p954_p10 = scmp.lt.u32.totalorder %s952_s28, %s948_s25  ;;  %p956_p12 = scmp.lt.u32.totalorder %s948_s25, %s1143_s10 }
 0x116   : > { %p950_p7 = pnand %p949_p4, %p1060_p5 }
 0x117   : > { %p955_p11 = por %p954_p10, %p953_p9 }
 0x118   : > { %p951_p8 = pneg %p950_p7 }
 0x119   : > { %p957_p13 = por %p956_p12, %p955_p11 }
 0x11b   : > { %p958_p0 = pnand %p957_p13, %p951_p8 }
 0x11d   : > { %961 = shalt.err (!%p958_p0)
}
 0x11e   : > { %s1000_s4 = smov 64   ;;  %s1001_s5 = smov 4  }
 0x11f   : > { %874 = dma.vmem_to_hbm [thread:$0]  (%p1060_p5), %s1145_s8, 1024, %s1143_s10, %s1153_s11, %s1000_s4, %s1000_s4, %s1001_s5  }
 0x120 PF: > { %p880_p1 = scmp.ge.s32.totalorder %s996_s15, 2  ;;  %s641_s6 = sand.u32 1, %s984_s12  }
 0x121   : > { %s642_s7 = scalar_lea.sflag [#allocation3], %s641_s6 }
 0x122   : > { %p877_p2 = pnand %p880_p1, %p1064_p6 }
 0x124   : > { %979 = dma.done.wait (!%p877_p2), %s642_s7, 1024  }
 0x125   : > { %981 = vsyncadd (!%p877_p2), %s642_s7, 4294966272  ;;  %p13_p3 = scmp.ge.s32.totalorder %s1047_s18, 4   ;;  %s1200_s12 = smov %s988_s13 }
 0x126   : > { %s1201_s13 = smov %s992_s14  ;;  %s1202_s14 = smov %s1058_s21 }
 0x127   : > { %s1203_s15 = smov %s1047_s18  ;;  %15 = sbr.rel (!%p13_p3) target bundleno = 3 (0x3), region = 70 }
 0x12e   :  { %647 = vsyncpa [#allocation3], 1 }
 0x12f   :  { %649 = vsyncpa [#allocation3 + $0x1], 1 }

</bundles_post_ra>
